<compile_context>
chip_gen: v7x
topology: tpu7x:2x2x1
jax: 0.10.0
libtpu: 0.0.40
codegen_flags: <defaults>
</compile_context>

<pallas_src>
import functools

import jax
import jax.numpy as jnp
from jax.experimental import pallas as pl
from jax.experimental.pallas import tpu as pltpu

DIM = 32          # hidden dim (as in the PyTorch module)
NUM_LAYERS = 5
BN_EPS = 1e-5     # torch.nn.BatchNorm1d default eps
GIN_EPS = 0.0     # torch_geometric GINConv default eps (train_eps=False)


# ----------------------------- Pallas kernel -------------------------------

def gin_net_kernel(x_ref, a_ref, p_ref,
                   w1_0_ref, b1_0_ref,        # layer 1 first linear (in_dim = num_features)
                   w1s_ref, b1s_ref,          # layers 2..5 first linear, stacked [4, DIM, DIM]
                   w2s_ref, b2s_ref,          # all layers second linear, stacked [5, DIM, DIM]
                   bn_scale_ref, bn_shift_ref,  # pre-folded eval-mode BatchNorm, [5, 1, DIM]
                   fc1_w_ref, fc1_b_ref, fc2_w_ref, fc2_b_ref,
                   o_ref):
    """Fused: 5x (GINConv -> ReLU -> BN) -> pool -> fc1 -> ReLU -> fc2 -> log_softmax."""
    a = a_ref[...]                      # [N, N] bf16, resident in VMEM for all layers
    h = x_ref[...]                      # [N, F] f32

    def gin_layer(h, w1, b1, l):
        # GIN aggregation (sum over in-neighbours) == A @ h on the bf16 MXU path,
        # accumulated in f32.
        agg = jnp.dot(a, h.astype(jnp.bfloat16), preferred_element_type=jnp.float32)
        z = (1.0 + GIN_EPS) * h + agg
        # nn = Sequential(Linear, ReLU, Linear)
        z = jnp.dot(z, w1, preferred_element_type=jnp.float32) + b1
        z = jnp.maximum(z, 0.0)
        z = jnp.dot(z, w2s_ref[l], preferred_element_type=jnp.float32) + b2s_ref[l]
        # F.relu(conv(x, edge_index)) then eval-mode BatchNorm1d (scale/shift pre-folded)
        z = jnp.maximum(z, 0.0)
        return z * bn_scale_ref[l] + bn_shift_ref[l]

    h = gin_layer(h, w1_0_ref[...], b1_0_ref[...], 0)
    for l in range(1, NUM_LAYERS):          # static unroll; h stays in VMEM/vregs
        h = gin_layer(h, w1s_ref[l - 1], b1s_ref[l - 1], l)

    # head: global_add_pool(x, batch) == P @ h
    pooled = jnp.dot(p_ref[...], h, preferred_element_type=jnp.float32)
    g = jnp.dot(pooled, fc1_w_ref[...], preferred_element_type=jnp.float32) + fc1_b_ref[...]
    g = jnp.maximum(g, 0.0)
    # TODO(synk): F.dropout(p=0.5) is identity here (inference, training=False).
    logits = jnp.dot(g, fc2_w_ref[...], preferred_element_type=jnp.float32) + fc2_b_ref[...]
    m = jnp.max(logits, axis=-1, keepdims=True)
    s = logits - m
    lse = jnp.log(jnp.sum(jnp.exp(s), axis=-1, keepdims=True))
    o_ref[...] = s - lse


# ------------------------------ wrapper ------------------------------------

@functools.partial(jax.jit, static_argnames=("num_graphs", "num_classes"))
def net_forward(x, edge_index, batch, params, num_graphs, num_classes):
    n, num_features = x.shape
    src, dst = edge_index[0], edge_index[1]
    # Dense adjacency A[dst, src] = #edges src->dst. Counts are exact in bf16.
    a = jnp.zeros((n, n), jnp.float32).at[dst, src].add(1.0).astype(jnp.bfloat16)
    # Graph pooling matrix P[g, i] = 1 iff node i belongs to graph g.
    p = (batch[None, :] == jnp.arange(num_graphs)[:, None]).astype(jnp.float32)

    args = (x, a, p) + tuple(params)

    # Advisory cost estimate for the XLA scheduler.
    flops = (
        NUM_LAYERS * 2 * n * n * DIM                    # aggregation A @ h per layer
        + 2 * n * num_features * DIM                    # layer-1 first linear
        + (2 * NUM_LAYERS - 1) * 2 * n * DIM * DIM      # remaining MLP matmuls
        + 2 * num_graphs * n * DIM                      # pooling P @ h
        + 2 * num_graphs * DIM * DIM                    # fc1
        + 2 * num_graphs * DIM * num_classes            # fc2
    )
    bytes_accessed = (sum(int(v.size) * v.dtype.itemsize for v in args)
                      + num_graphs * num_classes * 4)

    return pl.pallas_call(
        gin_net_kernel,
        out_shape=jax.ShapeDtypeStruct((num_graphs, num_classes), jnp.float32),
        in_specs=[pl.BlockSpec(memory_space=pltpu.MemorySpace.VMEM)] * len(args),
        out_specs=pl.BlockSpec(memory_space=pltpu.MemorySpace.VMEM),
        compiler_params=pltpu.CompilerParams(vmem_limit_bytes=32 * 1024 * 1024),
        cost_estimate=pl.CostEstimate(
            flops=flops,
            transcendentals=num_graphs * num_classes,
            bytes_accessed=bytes_accessed),
    )(*args)


# ----------------------- pure-JAX reference (f32) ---------------------------

def net_forward_ref(x, edge_index, batch, params, num_graphs, num_classes):
    (w1_0, b1_0, w1s, b1s, w2s, b2s, bn_scale, bn_shift, wf1, bf1, wf2, bf2) = params
    n = x.shape[0]
    src, dst = edge_index[0], edge_index[1]
    a = jnp.zeros((n, n), jnp.float32).at[dst, src].add(1.0)
    p = (batch[None, :] == jnp.arange(num_graphs)[:, None]).astype(jnp.float32)
    h = x
    for l in range(NUM_LAYERS):
        w1 = w1_0 if l == 0 else w1s[l - 1]
        b1 = b1_0 if l == 0 else b1s[l - 1]
        z = (1.0 + GIN_EPS) * h + a @ h
        z = jnp.maximum(z @ w1 + b1, 0.0)
        z = jnp.maximum(z @ w2s[l] + b2s[l], 0.0)
        h = z * bn_scale[l] + bn_shift[l]
    pooled = p @ h
    g = jnp.maximum(pooled @ wf1 + bf1, 0.0)
    logits = g @ wf2 + bf2
    return jax.nn.log_softmax(logits, axis=-1)


# --------------------------- parameter creation -----------------------------

def _linear(key, fan_in, fan_out):
    kw, kb = jax.random.split(key)
    bound = 1.0 / jnp.sqrt(fan_in)
    w = jax.random.uniform(kw, (fan_in, fan_out), jnp.float32, -bound, bound)
    b = jax.random.uniform(kb, (1, fan_out), jnp.float32, -bound, bound)
    return w, b


def make_params(key, num_features, num_classes):
    keys = jax.random.split(key, 12)
    w1_list, b1_list, w2_list, b2_list = [], [], [], []
    in_dim = num_features
    for i in range(NUM_LAYERS):
        w1, b1 = _linear(keys[2 * i], in_dim, DIM)
        w2, b2 = _linear(keys[2 * i + 1], DIM, DIM)
        w1_list.append(w1); b1_list.append(b1)
        w2_list.append(w2); b2_list.append(b2)
        in_dim = DIM

    # Eval-mode BatchNorm1d with PyTorch defaults (mean=0, var=1, gamma=1, beta=0),
    # pre-folded to per-channel scale & shift: y = scale * x + shift.
    gamma = jnp.ones((NUM_LAYERS, 1, DIM), jnp.float32)
    beta = jnp.zeros((NUM_LAYERS, 1, DIM), jnp.float32)
    r_mean = jnp.zeros((NUM_LAYERS, 1, DIM), jnp.float32)
    r_var = jnp.ones((NUM_LAYERS, 1, DIM), jnp.float32)
    bn_scale = gamma * jax.lax.rsqrt(r_var + BN_EPS)
    bn_shift = beta - r_mean * bn_scale

    wf1, bf1 = _linear(keys[10], DIM, DIM)
    wf2, bf2 = _linear(keys[11], DIM, num_classes)

    return (
        w1_list[0], b1_list[0],                             # layer 1 first linear
        jnp.stack(w1_list[1:]), jnp.stack(b1_list[1:]),     # [4, DIM, DIM], [4, 1, DIM]
        jnp.stack(w2_list), jnp.stack(b2_list),             # [5, DIM, DIM], [5, 1, DIM]
        bn_scale, bn_shift,                                 # [5, 1, DIM] each
        wf1, bf1, wf2, bf2,
    )


# --------------------------------- main -------------------------------------

if __name__ == "__main__":
    key = jax.random.PRNGKey(0)
    k_x, k_p = jax.random.split(key)

    num_features = 16      # stand-in for dataset.num_features
    num_classes = 2        # NCI1 has 2 classes
    num_graphs = 4
    nodes_per_graph = 8
    n = num_graphs * nodes_per_graph   # 32 nodes total

    # deterministic ring graph inside each of the 4 graphs, undirected edges
    offsets = jnp.arange(num_graphs, dtype=jnp.int32) * nodes_per_graph
    local = jnp.arange(nodes_per_graph, dtype=jnp.int32)
    src = (offsets[:, None] + local[None, :]).reshape(-1)
    dst = (offsets[:, None] + ((local + 1) % nodes_per_graph)[None, :]).reshape(-1)
    edge_index = jnp.stack([jnp.concatenate([src, dst]),
                            jnp.concatenate([dst, src])], axis=0)
    batch = jnp.repeat(jnp.arange(num_graphs, dtype=jnp.int32), nodes_per_graph)

    x = jax.random.normal(k_x, (n, num_features), dtype=jnp.float32)
    params = make_params(k_p, num_features, num_classes)

    out = net_forward(x, edge_index, batch, params, num_graphs, num_classes)
    out = jax.block_until_ready(out)

    assert out.shape == (num_graphs, num_classes)
    # rows of log_softmax must exponentiate-sum to 1
    assert jnp.allclose(jnp.sum(jnp.exp(out), axis=-1), 1.0, atol=1e-4)

    # validate bf16-aggregation kernel against the f32 reference (class probabilities)
    ref = net_forward_ref(x, edge_index, batch, params, num_graphs, num_classes)
    assert jnp.allclose(jnp.exp(out), jnp.exp(ref), atol=5e-2), (out, ref)

    print("KERNEL_OK")
</pallas_src>

<mosaic_0001>
module attributes {stable_mosaic.version = 11 : i64} {
  func.func private @main(%arg0: i32) attributes {dimension_semantics = [#tpu.dimension_semantics<core_parallel>], iteration_bounds = array<i64: 2>, tpu.core_type = #tpu.core_type<sc_scalar_subcore>, window_params = []} {
    return
  }
}

module attributes {stable_mosaic.version = 11 : i64} {
  func.func private @main(%arg0: i32) attributes {dimension_semantics = [#tpu.dimension_semantics<core_parallel>], iteration_bounds = array<i64: 2>, tpu.core_type = #tpu.core_type<sc_scalar_subcore>, window_params = []} {
    return
  }
}

module attributes {stable_mosaic.version = 11 : i64} {
  func.func @gin_net_kernel(%arg0: memref<32x16xf32, #tpu.memory_space<vmem>>, %arg1: memref<32x32xbf16, #tpu.memory_space<vmem>>, %arg2: memref<4x32xf32, #tpu.memory_space<vmem>>, %arg3: memref<16x32xf32, #tpu.memory_space<vmem>>, %arg4: memref<1x32xf32, #tpu.memory_space<vmem>>, %arg5: memref<4x32x32xf32, #tpu.memory_space<vmem>>, %arg6: memref<4x1x32xf32, #tpu.memory_space<vmem>>, %arg7: memref<5x32x32xf32, #tpu.memory_space<vmem>>, %arg8: memref<5x1x32xf32, #tpu.memory_space<vmem>>, %arg9: memref<5x1x32xf32, #tpu.memory_space<vmem>>, %arg10: memref<5x1x32xf32, #tpu.memory_space<vmem>>, %arg11: memref<32x32xf32, #tpu.memory_space<vmem>>, %arg12: memref<1x32xf32, #tpu.memory_space<vmem>>, %arg13: memref<32x2xf32, #tpu.memory_space<vmem>>, %arg14: memref<1x2xf32, #tpu.memory_space<vmem>>, %arg15: memref<4x2xf32, #tpu.memory_space<vmem>>) attributes {dimension_semantics = [], scalar_prefetch = 0 : i64, scratch_operands = 0 : i64, tpu.core_type = #tpu.core_type<tc>} {
    %c0 = arith.constant 0 : index
    %c0_0 = arith.constant 0 : index
    %0 = vector.load %arg1[%c0, %c0_0] : memref<32x32xbf16, #tpu.memory_space<vmem>>, vector<32x32xbf16>
    %c0_1 = arith.constant 0 : index
    %c0_2 = arith.constant 0 : index
    %1 = vector.load %arg0[%c0_1, %c0_2] : memref<32x16xf32, #tpu.memory_space<vmem>>, vector<32x16xf32>
    %c0_3 = arith.constant 0 : index
    %c0_4 = arith.constant 0 : index
    %2 = vector.load %arg3[%c0_3, %c0_4] : memref<16x32xf32, #tpu.memory_space<vmem>>, vector<16x32xf32>
    %c0_5 = arith.constant 0 : index
    %c0_6 = arith.constant 0 : index
    %3 = vector.load %arg4[%c0_5, %c0_6] : memref<1x32xf32, #tpu.memory_space<vmem>>, vector<1x32xf32>
    %4 = arith.truncf %1 : vector<32x16xf32> to vector<32x16xbf16>
    %cst = arith.constant dense<0.000000e+00> : vector<32x16xf32>
    %5 = tpu.matmul %0, %4, %cst {dimension_numbers = #tpu.dot_dimension_numbers<[1], [0], [0], [1], [0, 0, 1, 1], [], []>} : vector<32x32xbf16>, vector<32x16xbf16>, vector<32x16xf32> -> vector<32x16xf32>
    %cst_7 = arith.constant 1.000000e+00 : f32
    %6 = vector.broadcast %cst_7 : f32 to vector<32x16xf32>
    %7 = arith.mulf %6, %1 : vector<32x16xf32>
    %8 = arith.addf %7, %5 : vector<32x16xf32>
    %cst_8 = arith.constant dense<0.000000e+00> : vector<32x32xf32>
    %9 = tpu.matmul %8, %2, %cst_8 {dimension_numbers = #tpu.dot_dimension_numbers<[1], [0], [0], [1], [0, 0, 1, 1], [], []>} : vector<32x16xf32>, vector<16x32xf32>, vector<32x32xf32> -> vector<32x32xf32>
    %10 = vector.broadcast %3 : vector<1x32xf32> to vector<32x32xf32>
    %11 = arith.addf %9, %10 : vector<32x32xf32>
    %cst_9 = arith.constant 0.000000e+00 : f32
    %12 = vector.broadcast %cst_9 : f32 to vector<32x32xf32>
    %13 = arith.maximumf %11, %12 : vector<32x32xf32>
    %c0_10 = arith.constant 0 : index
    %c0_11 = arith.constant 0 : index
    %c0_12 = arith.constant 0 : index
    %14 = vector.load %arg7[%c0_10, %c0_11, %c0_12] : memref<5x32x32xf32, #tpu.memory_space<vmem>>, vector<1x32x32xf32>
    %15 = vector.shape_cast %14 : vector<1x32x32xf32> to vector<32x32xf32>
    %cst_13 = arith.constant dense<0.000000e+00> : vector<32x32xf32>
    %16 = tpu.matmul %13, %15, %cst_13 {dimension_numbers = #tpu.dot_dimension_numbers<[1], [0], [0], [1], [0, 0, 1, 1], [], []>} : vector<32x32xf32>, vector<32x32xf32>, vector<32x32xf32> -> vector<32x32xf32>
    %c0_14 = arith.constant 0 : index
    %c0_15 = arith.constant 0 : index
    %c0_16 = arith.constant 0 : index
    %17 = vector.load %arg8[%c0_14, %c0_15, %c0_16] : memref<5x1x32xf32, #tpu.memory_space<vmem>>, vector<1x1x32xf32>
    %18 = vector.shape_cast %17 : vector<1x1x32xf32> to vector<1x32xf32>
    %19 = vector.broadcast %18 : vector<1x32xf32> to vector<32x32xf32>
    %20 = arith.addf %16, %19 : vector<32x32xf32>
    %cst_17 = arith.constant 0.000000e+00 : f32
    %21 = vector.broadcast %cst_17 : f32 to vector<32x32xf32>
    %22 = arith.maximumf %20, %21 : vector<32x32xf32>
    %c0_18 = arith.constant 0 : index
    %c0_19 = arith.constant 0 : index
    %c0_20 = arith.constant 0 : index
    %23 = vector.load %arg9[%c0_18, %c0_19, %c0_20] : memref<5x1x32xf32, #tpu.memory_space<vmem>>, vector<1x1x32xf32>
    %24 = vector.shape_cast %23 : vector<1x1x32xf32> to vector<1x32xf32>
    %25 = vector.broadcast %24 : vector<1x32xf32> to vector<32x32xf32>
    %26 = arith.mulf %22, %25 : vector<32x32xf32>
    %c0_21 = arith.constant 0 : index
    %c0_22 = arith.constant 0 : index
    %c0_23 = arith.constant 0 : index
    %27 = vector.load %arg10[%c0_21, %c0_22, %c0_23] : memref<5x1x32xf32, #tpu.memory_space<vmem>>, vector<1x1x32xf32>
    %28 = vector.shape_cast %27 : vector<1x1x32xf32> to vector<1x32xf32>
    %29 = vector.broadcast %28 : vector<1x32xf32> to vector<32x32xf32>
    %30 = arith.addf %26, %29 : vector<32x32xf32>
    %c0_24 = arith.constant 0 : index
    %c0_25 = arith.constant 0 : index
    %c0_26 = arith.constant 0 : index
    %31 = vector.load %arg5[%c0_24, %c0_25, %c0_26] : memref<4x32x32xf32, #tpu.memory_space<vmem>>, vector<1x32x32xf32>
    %32 = vector.shape_cast %31 : vector<1x32x32xf32> to vector<32x32xf32>
    %c0_27 = arith.constant 0 : index
    %c0_28 = arith.constant 0 : index
    %c0_29 = arith.constant 0 : index
    %33 = vector.load %arg6[%c0_27, %c0_28, %c0_29] : memref<4x1x32xf32, #tpu.memory_space<vmem>>, vector<1x1x32xf32>
    %34 = vector.shape_cast %33 : vector<1x1x32xf32> to vector<1x32xf32>
    %35 = arith.truncf %30 : vector<32x32xf32> to vector<32x32xbf16>
    %cst_30 = arith.constant dense<0.000000e+00> : vector<32x32xf32>
    %36 = tpu.matmul %0, %35, %cst_30 {dimension_numbers = #tpu.dot_dimension_numbers<[1], [0], [0], [1], [0, 0, 1, 1], [], []>} : vector<32x32xbf16>, vector<32x32xbf16>, vector<32x32xf32> -> vector<32x32xf32>
    %cst_31 = arith.constant 1.000000e+00 : f32
    %37 = vector.broadcast %cst_31 : f32 to vector<32x32xf32>
    %38 = arith.mulf %37, %30 : vector<32x32xf32>
    %39 = arith.addf %38, %36 : vector<32x32xf32>
    %cst_32 = arith.constant dense<0.000000e+00> : vector<32x32xf32>
    %40 = tpu.matmul %39, %32, %cst_32 {dimension_numbers = #tpu.dot_dimension_numbers<[1], [0], [0], [1], [0, 0, 1, 1], [], []>} : vector<32x32xf32>, vector<32x32xf32>, vector<32x32xf32> -> vector<32x32xf32>
    %41 = vector.broadcast %34 : vector<1x32xf32> to vector<32x32xf32>
    %42 = arith.addf %40, %41 : vector<32x32xf32>
    %cst_33 = arith.constant 0.000000e+00 : f32
    %43 = vector.broadcast %cst_33 : f32 to vector<32x32xf32>
    %44 = arith.maximumf %42, %43 : vector<32x32xf32>
    %c1 = arith.constant 1 : index
    %c0_34 = arith.constant 0 : index
    %c0_35 = arith.constant 0 : index
    %45 = vector.load %arg7[%c1, %c0_34, %c0_35] : memref<5x32x32xf32, #tpu.memory_space<vmem>>, vector<1x32x32xf32>
    %46 = vector.shape_cast %45 : vector<1x32x32xf32> to vector<32x32xf32>
    %cst_36 = arith.constant dense<0.000000e+00> : vector<32x32xf32>
    %47 = tpu.matmul %44, %46, %cst_36 {dimension_numbers = #tpu.dot_dimension_numbers<[1], [0], [0], [1], [0, 0, 1, 1], [], []>} : vector<32x32xf32>, vector<32x32xf32>, vector<32x32xf32> -> vector<32x32xf32>
    %c1_37 = arith.constant 1 : index
    %c0_38 = arith.constant 0 : index
    %c0_39 = arith.constant 0 : index
    %48 = vector.load %arg8[%c1_37, %c0_38, %c0_39] : memref<5x1x32xf32, #tpu.memory_space<vmem>>, vector<1x1x32xf32>
    %49 = vector.shape_cast %48 : vector<1x1x32xf32> to vector<1x32xf32>
    %50 = vector.broadcast %49 : vector<1x32xf32> to vector<32x32xf32>
    %51 = arith.addf %47, %50 : vector<32x32xf32>
    %cst_40 = arith.constant 0.000000e+00 : f32
    %52 = vector.broadcast %cst_40 : f32 to vector<32x32xf32>
    %53 = arith.maximumf %51, %52 : vector<32x32xf32>
    %c1_41 = arith.constant 1 : index
    %c0_42 = arith.constant 0 : index
    %c0_43 = arith.constant 0 : index
    %54 = vector.load %arg9[%c1_41, %c0_42, %c0_43] : memref<5x1x32xf32, #tpu.memory_space<vmem>>, vector<1x1x32xf32>
    %55 = vector.shape_cast %54 : vector<1x1x32xf32> to vector<1x32xf32>
    %56 = vector.broadcast %55 : vector<1x32xf32> to vector<32x32xf32>
    %57 = arith.mulf %53, %56 : vector<32x32xf32>
    %c1_44 = arith.constant 1 : index
    %c0_45 = arith.constant 0 : index
    %c0_46 = arith.constant 0 : index
    %58 = vector.load %arg10[%c1_44, %c0_45, %c0_46] : memref<5x1x32xf32, #tpu.memory_space<vmem>>, vector<1x1x32xf32>
    %59 = vector.shape_cast %58 : vector<1x1x32xf32> to vector<1x32xf32>
    %60 = vector.broadcast %59 : vector<1x32xf32> to vector<32x32xf32>
    %61 = arith.addf %57, %60 : vector<32x32xf32>
    %c1_47 = arith.constant 1 : index
    %c0_48 = arith.constant 0 : index
    %c0_49 = arith.constant 0 : index
    %62 = vector.load %arg5[%c1_47, %c0_48, %c0_49] : memref<4x32x32xf32, #tpu.memory_space<vmem>>, vector<1x32x32xf32>
    %63 = vector.shape_cast %62 : vector<1x32x32xf32> to vector<32x32xf32>
    %c1_50 = arith.constant 1 : index
    %c0_51 = arith.constant 0 : index
    %c0_52 = arith.constant 0 : index
    %64 = vector.load %arg6[%c1_50, %c0_51, %c0_52] : memref<4x1x32xf32, #tpu.memory_space<vmem>>, vector<1x1x32xf32>
    %65 = vector.shape_cast %64 : vector<1x1x32xf32> to vector<1x32xf32>
    %66 = arith.truncf %61 : vector<32x32xf32> to vector<32x32xbf16>
    %cst_53 = arith.constant dense<0.000000e+00> : vector<32x32xf32>
    %67 = tpu.matmul %0, %66, %cst_53 {dimension_numbers = #tpu.dot_dimension_numbers<[1], [0], [0], [1], [0, 0, 1, 1], [], []>} : vector<32x32xbf16>, vector<32x32xbf16>, vector<32x32xf32> -> vector<32x32xf32>
    %cst_54 = arith.constant 1.000000e+00 : f32
    %68 = vector.broadcast %cst_54 : f32 to vector<32x32xf32>
    %69 = arith.mulf %68, %61 : vector<32x32xf32>
    %70 = arith.addf %69, %67 : vector<32x32xf32>
    %cst_55 = arith.constant dense<0.000000e+00> : vector<32x32xf32>
    %71 = tpu.matmul %70, %63, %cst_55 {dimension_numbers = #tpu.dot_dimension_numbers<[1], [0], [0], [1], [0, 0, 1, 1], [], []>} : vector<32x32xf32>, vector<32x32xf32>, vector<32x32xf32> -> vector<32x32xf32>
    %72 = vector.broadcast %65 : vector<1x32xf32> to vector<32x32xf32>
    %73 = arith.addf %71, %72 : vector<32x32xf32>
    %cst_56 = arith.constant 0.000000e+00 : f32
    %74 = vector.broadcast %cst_56 : f32 to vector<32x32xf32>
    %75 = arith.maximumf %73, %74 : vector<32x32xf32>
    %c2 = arith.constant 2 : index
    %c0_57 = arith.constant 0 : index
    %c0_58 = arith.constant 0 : index
    %76 = vector.load %arg7[%c2, %c0_57, %c0_58] : memref<5x32x32xf32, #tpu.memory_space<vmem>>, vector<1x32x32xf32>
    %77 = vector.shape_cast %76 : vector<1x32x32xf32> to vector<32x32xf32>
    %cst_59 = arith.constant dense<0.000000e+00> : vector<32x32xf32>
    %78 = tpu.matmul %75, %77, %cst_59 {dimension_numbers = #tpu.dot_dimension_numbers<[1], [0], [0], [1], [0, 0, 1, 1], [], []>} : vector<32x32xf32>, vector<32x32xf32>, vector<32x32xf32> -> vector<32x32xf32>
    %c2_60 = arith.constant 2 : index
    %c0_61 = arith.constant 0 : index
    %c0_62 = arith.constant 0 : index
    %79 = vector.load %arg8[%c2_60, %c0_61, %c0_62] : memref<5x1x32xf32, #tpu.memory_space<vmem>>, vector<1x1x32xf32>
    %80 = vector.shape_cast %79 : vector<1x1x32xf32> to vector<1x32xf32>
    %81 = vector.broadcast %80 : vector<1x32xf32> to vector<32x32xf32>
    %82 = arith.addf %78, %81 : vector<32x32xf32>
    %cst_63 = arith.constant 0.000000e+00 : f32
    %83 = vector.broadcast %cst_63 : f32 to vector<32x32xf32>
    %84 = arith.maximumf %82, %83 : vector<32x32xf32>
    %c2_64 = arith.constant 2 : index
    %c0_65 = arith.constant 0 : index
    %c0_66 = arith.constant 0 : index
    %85 = vector.load %arg9[%c2_64, %c0_65, %c0_66] : memref<5x1x32xf32, #tpu.memory_space<vmem>>, vector<1x1x32xf32>
    %86 = vector.shape_cast %85 : vector<1x1x32xf32> to vector<1x32xf32>
    %87 = vector.broadcast %86 : vector<1x32xf32> to vector<32x32xf32>
    %88 = arith.mulf %84, %87 : vector<32x32xf32>
    %c2_67 = arith.constant 2 : index
    %c0_68 = arith.constant 0 : index
    %c0_69 = arith.constant 0 : index
    %89 = vector.load %arg10[%c2_67, %c0_68, %c0_69] : memref<5x1x32xf32, #tpu.memory_space<vmem>>, vector<1x1x32xf32>
    %90 = vector.shape_cast %89 : vector<1x1x32xf32> to vector<1x32xf32>
    %91 = vector.broadcast %90 : vector<1x32xf32> to vector<32x32xf32>
    %92 = arith.addf %88, %91 : vector<32x32xf32>
    %c2_70 = arith.constant 2 : index
    %c0_71 = arith.constant 0 : index
    %c0_72 = arith.constant 0 : index
    %93 = vector.load %arg5[%c2_70, %c0_71, %c0_72] : memref<4x32x32xf32, #tpu.memory_space<vmem>>, vector<1x32x32xf32>
    %94 = vector.shape_cast %93 : vector<1x32x32xf32> to vector<32x32xf32>
    %c2_73 = arith.constant 2 : index
    %c0_74 = arith.constant 0 : index
    %c0_75 = arith.constant 0 : index
    %95 = vector.load %arg6[%c2_73, %c0_74, %c0_75] : memref<4x1x32xf32, #tpu.memory_space<vmem>>, vector<1x1x32xf32>
    %96 = vector.shape_cast %95 : vector<1x1x32xf32> to vector<1x32xf32>
    %97 = arith.truncf %92 : vector<32x32xf32> to vector<32x32xbf16>
    %cst_76 = arith.constant dense<0.000000e+00> : vector<32x32xf32>
    %98 = tpu.matmul %0, %97, %cst_76 {dimension_numbers = #tpu.dot_dimension_numbers<[1], [0], [0], [1], [0, 0, 1, 1], [], []>} : vector<32x32xbf16>, vector<32x32xbf16>, vector<32x32xf32> -> vector<32x32xf32>
    %cst_77 = arith.constant 1.000000e+00 : f32
    %99 = vector.broadcast %cst_77 : f32 to vector<32x32xf32>
    %100 = arith.mulf %99, %92 : vector<32x32xf32>
    %101 = arith.addf %100, %98 : vector<32x32xf32>
    %cst_78 = arith.constant dense<0.000000e+00> : vector<32x32xf32>
    %102 = tpu.matmul %101, %94, %cst_78 {dimension_numbers = #tpu.dot_dimension_numbers<[1], [0], [0], [1], [0, 0, 1, 1], [], []>} : vector<32x32xf32>, vector<32x32xf32>, vector<32x32xf32> -> vector<32x32xf32>
    %103 = vector.broadcast %96 : vector<1x32xf32> to vector<32x32xf32>
    %104 = arith.addf %102, %103 : vector<32x32xf32>
    %cst_79 = arith.constant 0.000000e+00 : f32
    %105 = vector.broadcast %cst_79 : f32 to vector<32x32xf32>
    %106 = arith.maximumf %104, %105 : vector<32x32xf32>
    %c3 = arith.constant 3 : index
    %c0_80 = arith.constant 0 : index
    %c0_81 = arith.constant 0 : index
    %107 = vector.load %arg7[%c3, %c0_80, %c0_81] : memref<5x32x32xf32, #tpu.memory_space<vmem>>, vector<1x32x32xf32>
    %108 = vector.shape_cast %107 : vector<1x32x32xf32> to vector<32x32xf32>
    %cst_82 = arith.constant dense<0.000000e+00> : vector<32x32xf32>
    %109 = tpu.matmul %106, %108, %cst_82 {dimension_numbers = #tpu.dot_dimension_numbers<[1], [0], [0], [1], [0, 0, 1, 1], [], []>} : vector<32x32xf32>, vector<32x32xf32>, vector<32x32xf32> -> vector<32x32xf32>
    %c3_83 = arith.constant 3 : index
    %c0_84 = arith.constant 0 : index
    %c0_85 = arith.constant 0 : index
    %110 = vector.load %arg8[%c3_83, %c0_84, %c0_85] : memref<5x1x32xf32, #tpu.memory_space<vmem>>, vector<1x1x32xf32>
    %111 = vector.shape_cast %110 : vector<1x1x32xf32> to vector<1x32xf32>
    %112 = vector.broadcast %111 : vector<1x32xf32> to vector<32x32xf32>
    %113 = arith.addf %109, %112 : vector<32x32xf32>
    %cst_86 = arith.constant 0.000000e+00 : f32
    %114 = vector.broadcast %cst_86 : f32 to vector<32x32xf32>
    %115 = arith.maximumf %113, %114 : vector<32x32xf32>
    %c3_87 = arith.constant 3 : index
    %c0_88 = arith.constant 0 : index
    %c0_89 = arith.constant 0 : index
    %116 = vector.load %arg9[%c3_87, %c0_88, %c0_89] : memref<5x1x32xf32, #tpu.memory_space<vmem>>, vector<1x1x32xf32>
    %117 = vector.shape_cast %116 : vector<1x1x32xf32> to vector<1x32xf32>
    %118 = vector.broadcast %117 : vector<1x32xf32> to vector<32x32xf32>
    %119 = arith.mulf %115, %118 : vector<32x32xf32>
    %c3_90 = arith.constant 3 : index
    %c0_91 = arith.constant 0 : index
    %c0_92 = arith.constant 0 : index
    %120 = vector.load %arg10[%c3_90, %c0_91, %c0_92] : memref<5x1x32xf32, #tpu.memory_space<vmem>>, vector<1x1x32xf32>
    %121 = vector.shape_cast %120 : vector<1x1x32xf32> to vector<1x32xf32>
    %122 = vector.broadcast %121 : vector<1x32xf32> to vector<32x32xf32>
    %123 = arith.addf %119, %122 : vector<32x32xf32>
    %c3_93 = arith.constant 3 : index
    %c0_94 = arith.constant 0 : index
    %c0_95 = arith.constant 0 : index
    %124 = vector.load %arg5[%c3_93, %c0_94, %c0_95] : memref<4x32x32xf32, #tpu.memory_space<vmem>>, vector<1x32x32xf32>
    %125 = vector.shape_cast %124 : vector<1x32x32xf32> to vector<32x32xf32>
    %c3_96 = arith.constant 3 : index
    %c0_97 = arith.constant 0 : index
    %c0_98 = arith.constant 0 : index
    %126 = vector.load %arg6[%c3_96, %c0_97, %c0_98] : memref<4x1x32xf32, #tpu.memory_space<vmem>>, vector<1x1x32xf32>
    %127 = vector.shape_cast %126 : vector<1x1x32xf32> to vector<1x32xf32>
    %128 = arith.truncf %123 : vector<32x32xf32> to vector<32x32xbf16>
    %cst_99 = arith.constant dense<0.000000e+00> : vector<32x32xf32>
    %129 = tpu.matmul %0, %128, %cst_99 {dimension_numbers = #tpu.dot_dimension_numbers<[1], [0], [0], [1], [0, 0, 1, 1], [], []>} : vector<32x32xbf16>, vector<32x32xbf16>, vector<32x32xf32> -> vector<32x32xf32>
    %cst_100 = arith.constant 1.000000e+00 : f32
    %130 = vector.broadcast %cst_100 : f32 to vector<32x32xf32>
    %131 = arith.mulf %130, %123 : vector<32x32xf32>
    %132 = arith.addf %131, %129 : vector<32x32xf32>
    %cst_101 = arith.constant dense<0.000000e+00> : vector<32x32xf32>
    %133 = tpu.matmul %132, %125, %cst_101 {dimension_numbers = #tpu.dot_dimension_numbers<[1], [0], [0], [1], [0, 0, 1, 1], [], []>} : vector<32x32xf32>, vector<32x32xf32>, vector<32x32xf32> -> vector<32x32xf32>
    %134 = vector.broadcast %127 : vector<1x32xf32> to vector<32x32xf32>
    %135 = arith.addf %133, %134 : vector<32x32xf32>
    %cst_102 = arith.constant 0.000000e+00 : f32
    %136 = vector.broadcast %cst_102 : f32 to vector<32x32xf32>
    %137 = arith.maximumf %135, %136 : vector<32x32xf32>
    %c4 = arith.constant 4 : index
    %c0_103 = arith.constant 0 : index
    %c0_104 = arith.constant 0 : index
    %138 = vector.load %arg7[%c4, %c0_103, %c0_104] : memref<5x32x32xf32, #tpu.memory_space<vmem>>, vector<1x32x32xf32>
    %139 = vector.shape_cast %138 : vector<1x32x32xf32> to vector<32x32xf32>
    %cst_105 = arith.constant dense<0.000000e+00> : vector<32x32xf32>
    %140 = tpu.matmul %137, %139, %cst_105 {dimension_numbers = #tpu.dot_dimension_numbers<[1], [0], [0], [1], [0, 0, 1, 1], [], []>} : vector<32x32xf32>, vector<32x32xf32>, vector<32x32xf32> -> vector<32x32xf32>
    %c4_106 = arith.constant 4 : index
    %c0_107 = arith.constant 0 : index
    %c0_108 = arith.constant 0 : index
    %141 = vector.load %arg8[%c4_106, %c0_107, %c0_108] : memref<5x1x32xf32, #tpu.memory_space<vmem>>, vector<1x1x32xf32>
    %142 = vector.shape_cast %141 : vector<1x1x32xf32> to vector<1x32xf32>
    %143 = vector.broadcast %142 : vector<1x32xf32> to vector<32x32xf32>
    %144 = arith.addf %140, %143 : vector<32x32xf32>
    %cst_109 = arith.constant 0.000000e+00 : f32
    %145 = vector.broadcast %cst_109 : f32 to vector<32x32xf32>
    %146 = arith.maximumf %144, %145 : vector<32x32xf32>
    %c4_110 = arith.constant 4 : index
    %c0_111 = arith.constant 0 : index
    %c0_112 = arith.constant 0 : index
    %147 = vector.load %arg9[%c4_110, %c0_111, %c0_112] : memref<5x1x32xf32, #tpu.memory_space<vmem>>, vector<1x1x32xf32>
    %148 = vector.shape_cast %147 : vector<1x1x32xf32> to vector<1x32xf32>
    %149 = vector.broadcast %148 : vector<1x32xf32> to vector<32x32xf32>
    %150 = arith.mulf %146, %149 : vector<32x32xf32>
    %c4_113 = arith.constant 4 : index
    %c0_114 = arith.constant 0 : index
    %c0_115 = arith.constant 0 : index
    %151 = vector.load %arg10[%c4_113, %c0_114, %c0_115] : memref<5x1x32xf32, #tpu.memory_space<vmem>>, vector<1x1x32xf32>
    %152 = vector.shape_cast %151 : vector<1x1x32xf32> to vector<1x32xf32>
    %153 = vector.broadcast %152 : vector<1x32xf32> to vector<32x32xf32>
    %154 = arith.addf %150, %153 : vector<32x32xf32>
    %c0_116 = arith.constant 0 : index
    %c0_117 = arith.constant 0 : index
    %155 = vector.load %arg2[%c0_116, %c0_117] : memref<4x32xf32, #tpu.memory_space<vmem>>, vector<4x32xf32>
    %cst_118 = arith.constant dense<0.000000e+00> : vector<4x32xf32>
    %156 = tpu.matmul %155, %154, %cst_118 {dimension_numbers = #tpu.dot_dimension_numbers<[1], [0], [0], [1], [0, 0, 1, 1], [], []>} : vector<4x32xf32>, vector<32x32xf32>, vector<4x32xf32> -> vector<4x32xf32>
    %c0_119 = arith.constant 0 : index
    %c0_120 = arith.constant 0 : index
    %157 = vector.load %arg11[%c0_119, %c0_120] : memref<32x32xf32, #tpu.memory_space<vmem>>, vector<32x32xf32>
    %cst_121 = arith.constant dense<0.000000e+00> : vector<4x32xf32>
    %158 = tpu.matmul %156, %157, %cst_121 {dimension_numbers = #tpu.dot_dimension_numbers<[1], [0], [0], [1], [0, 0, 1, 1], [], []>} : vector<4x32xf32>, vector<32x32xf32>, vector<4x32xf32> -> vector<4x32xf32>
    %c0_122 = arith.constant 0 : index
    %c0_123 = arith.constant 0 : index
    %159 = vector.load %arg12[%c0_122, %c0_123] : memref<1x32xf32, #tpu.memory_space<vmem>>, vector<1x32xf32>
    %160 = vector.broadcast %159 : vector<1x32xf32> to vector<4x32xf32>
    %161 = arith.addf %158, %160 : vector<4x32xf32>
    %cst_124 = arith.constant 0.000000e+00 : f32
    %162 = vector.broadcast %cst_124 : f32 to vector<4x32xf32>
    %163 = arith.maximumf %161, %162 : vector<4x32xf32>
    %c0_125 = arith.constant 0 : index
    %c0_126 = arith.constant 0 : index
    %164 = vector.load %arg13[%c0_125, %c0_126] : memref<32x2xf32, #tpu.memory_space<vmem>>, vector<32x2xf32>
    %cst_127 = arith.constant dense<0.000000e+00> : vector<4x2xf32>
    %165 = tpu.matmul %163, %164, %cst_127 {dimension_numbers = #tpu.dot_dimension_numbers<[1], [0], [0], [1], [0, 0, 1, 1], [], []>} : vector<4x32xf32>, vector<32x2xf32>, vector<4x2xf32> -> vector<4x2xf32>
    %c0_128 = arith.constant 0 : index
    %c0_129 = arith.constant 0 : index
    %166 = vector.load %arg14[%c0_128, %c0_129] : memref<1x2xf32, #tpu.memory_space<vmem>>, vector<1x2xf32>
    %167 = vector.broadcast %166 : vector<1x2xf32> to vector<4x2xf32>
    %168 = arith.addf %165, %167 : vector<4x2xf32>
    %cst_130 = arith.constant dense<0xFF800000> : vector<4xf32>
    %169 = vector.multi_reduction <maximumf>, %168, %cst_130 [1] : vector<4x2xf32> to vector<4xf32>
    %170 = vector.shape_cast %169 : vector<4xf32> to vector<4x1xf32>
    %171 = vector.broadcast %170 : vector<4x1xf32> to vector<4x2xf32>
    %172 = arith.subf %168, %171 : vector<4x2xf32>
    %173 = math.exp %172 : vector<4x2xf32>
    %cst_131 = arith.constant dense<0.000000e+00> : vector<4xf32>
    %174 = vector.multi_reduction <add>, %173, %cst_131 [1] : vector<4x2xf32> to vector<4xf32>
    %175 = vector.shape_cast %174 : vector<4xf32> to vector<4x1xf32>
    %176 = math.log %175 : vector<4x1xf32>
    %177 = vector.broadcast %176 : vector<4x1xf32> to vector<4x2xf32>
    %178 = arith.subf %172, %177 : vector<4x2xf32>
    %c0_132 = arith.constant 0 : index
    %c0_133 = arith.constant 0 : index
    %179 = vector.load %arg15[%c0_132, %c0_133] : memref<4x2xf32, #tpu.memory_space<vmem>>, vector<4x2xf32>
    tpu.vector_store %arg15[%c0_132, %c0_133], %178 {strides = array<i32>} : memref<4x2xf32, #tpu.memory_space<vmem>>, vector<4x2xf32>,
    return
  }
}

</mosaic_0001>

<bundles_post_ra>
// kernel: net_forward.1
= control target key start
LH: loop header
LB: loop body
LE: loop exit
PB: predicated region body
PF: predicated region fallthrough
CT: control target
= control target key end

     0   :  { %vm74_vm0 = vcmask 261120   ;;  %vm140_vm1 = vcmask 130048   ;;  %vm2409_vm2 = vmmov 0   ;;  %vm1845_vm3 = vcmask 11264   ;;  %s2788_s0 = inlined_call_operand.vmem [shape: f32[32,16], index: 0, kind: input, shape index: {}]   ;;  %s2789_s1 = inlined_call_operand.vmem [shape: bf16[32,32], index: 1, kind: input, shape index: {}]   ;;  %s2790_s3 = inlined_call_operand.vmem [shape: f32[16,32], index: 3, kind: input, shape index: {}]   ;;  %s2791_s7 = inlined_call_operand.vmem [shape: f32[5,32,32], index: 7, kind: input, shape index: {}]   ;;  %s2792_s4 = inlined_call_operand.vmem [shape: f32[1,32], index: 4, kind: input, shape index: {}]   ;;  %s2793_s5 = inlined_call_operand.vmem [shape: f32[4,32,32], index: 5, kind: input, shape index: {}]   ;;  %s2794_s8 = inlined_call_operand.vmem [shape: f32[5,1,32], index: 8, kind: input, shape index: {}]   ;;  %s2795_s9 = inlined_call_operand.vmem [shape: f32[5,1,32], index: 9, kind: input, shape index: {}]   ;;  %s2796_s10 = inlined_call_operand.vmem [shape: f32[5,1,32], index: 10, kind: input, shape index: {}]   ;;  %s2797_s6 = inlined_call_operand.vmem [shape: f32[4,1,32], index: 6, kind: input, shape index: {}]   ;;  %s2798_s11 = inlined_call_operand.vmem [shape: f32[32,32], index: 11, kind: input, shape index: {}]   ;;  %s2799_s2 = inlined_call_operand.vmem [shape: f32[4,32], index: 2, kind: input, shape index: {}]   ;;  %s2800_s13 = inlined_call_operand.vmem [shape: f32[32,2], index: 13, kind: input, shape index: {}]   ;;  %s2801_s12 = inlined_call_operand.vmem [shape: f32[1,32], index: 12, kind: input, shape index: {}]   ;;  %s2802_s14 = inlined_call_operand.vmem [shape: f32[1,2], index: 14, kind: input, shape index: {}]   ;;  %s2803_s15 = inlined_call_operand.vmem [shape: f32[4,2], index: 15, kind: output, shape index: {}]  }
   0x1   :  { %v55_v0 = vld [vmem:[%s2788_s0] sm:$0xff]  ;;  %v56_v1 = vld [vmem:[%s2788_s0 + $0x8] sm:$0xff]  ;;  %v57_v2 = vld [vmem:[%s2788_s0 + $0x10] sm:$0xff] }
   0x2   :  { %v62_v3 = vpack.c.bf16 %v56_v1, %v55_v0  ;;  %v58_v4 = vld [vmem:[%s2788_s0 + $0x18] sm:$0xff]  ;;  %v2506_v6 = vld [vmem:[%s2789_s1] sm:$0xff]   ;;  %v2513_v7 = vld [vmem:[%s2789_s1 + $0x8] sm:$0xff]  }
   0x3   :  { %v63_v5 = vpack.c.bf16 %v58_v4, %v57_v2  ;;  %2100 = vmatprep.mubr.msk.bf16.mxu0 %vm74_vm0, %v2506_v6  ;;  %v59_v8 = vld [vmem:[%s2790_s3] sm:$0xff]  ;;  %v60_v9 = vld [vmem:[%s2790_s3 + $0x8] sm:$0xff]  ;;  %v244_v22 = vld [vmem:[%s2791_s7 + $0x10] sm:$0xff] }
   0x4   :  { %2096 = vmatprep.subr.bf16.mxu0 %v62_v3  ;;  %v2305_v10 = vpack.c.bf16 %v60_v9, %v59_v8  ;;  %v242_v11 = vld [vmem:[%s2791_s7] sm:$0xff]  ;;  %v243_v12 = vld [vmem:[%s2791_s7 + $0x8] sm:$0xff]  ;;  %v245_v23 = vld [vmem:[%s2791_s7 + $0x18] sm:$0xff] }
   0x5   :  { %2097 = vmatpush3.bf16.msra.mxu0 %v62_v3  ;;  %v2309_v13 = vpack.c.bf16 %v243_v12, %v242_v11  ;;  %v2313_v24 = vpack.c.bf16 %v245_v23, %v244_v22  ;;  %v1867_v25 = vld [vmem:[%s2792_s4] ss:$0 sm:$0xff]  ;;  %v377_v39 = vld [vmem:[%s2793_s5 + $0x8] sm:$0xff]  ;;  %v379_v3 = vld [vmem:[%s2793_s5 + $0x18] sm:$0xff] }
   0x6   :  { %2098 = vmatprep.subr.bf16.mxu0 %v63_v5  ;;  %2306 = vmatprep.subr.bf16.mxu1 %v2305_v10  ;;  %v376_v38 = vld [vmem:[%s2793_s5] sm:$0xff]  ;;  %v1887_v8 = vld [vmem:[%s2791_s7 + $0x28] sm:$0xff] }
   0x7   :  { %2308 = vmatpush3.bf16.msra.mxu1 %v2305_v10  ;;  %v2317_v40 = vpack.c.bf16 %v377_v39, %v376_v38  ;;  %v1872_v41 = vld [vmem:[%s2794_s8] ss:$0 sm:$0xff] }
   0x8   :  { %2310 = vmatprep.subr.bf16.mxu1 %v2309_v13  ;;  %v1877_v45 = vld [vmem:[%s2795_s9] ss:$0 sm:$0xff] }
   0x9   :  { %2099 = vmatpush3.bf16.msra.mxu0 %v63_v5  ;;  %v1878_v48 = vld [vmem:[%s2796_s10] ss:$0 sm:$0xff] }
   0xa   :  { %v1886_v5 = vld [vmem:[%s2791_s7 + $0x20] sm:$0xff] }
   0xb   :  { %v2325_v9 = vpack.c.bf16 %v1887_v8, %v1886_v5 }
   0xc   :  { %2101 = vmatmul.mubr.msk.bf16.vlgmr.msra.gmra.mrb[0].mxu0 %vm74_vm0, %v2513_v7 }
   0xd   :  { %2132 = vmatprep.mubr.msk.bf16.mxu0 %vm74_vm0, %v2506_v6 }
  0xdf   :  { %v2102_v14 = vpop.f32.mrb[0].mxu0 }
  0xe0   :  { %v115_v15 = vpop.f32.mrb[1].mxu0  ;;  %v132_v20 = vadd.f32 %v2102_v14, %v57_v2  ;;  %v378_v2 = vld [vmem:[%s2793_s5 + $0x10] sm:$0xff] }
  0xe1   :  { %v130_v16 = vadd.f32 %v115_v15, %v55_v0  ;;  %v2103_v17 = vpop.f32.mrb[2].mxu0 }
  0xe2   :  { %v118_v18 = vpop.f32.mrb[3].mxu0  ;;  %v133_v21 = vadd.f32 %v2103_v17, %v58_v4  ;;  %v2321_v4 = vpack.c.bf16 %v379_v3, %v378_v2  ;;  %v1913_v2 = vld [vmem:[%s2791_s7 + $0x48] sm:$0xff] }
  0xe3   :  { %v131_v19 = vadd.f32 %v118_v18, %v56_v1  ;;  %2108 = vmatprep.mubr.msk.f32.mxu1 %vm140_vm1, %v130_v16  ;;  %v1888_v18 = vld [vmem:[%s2791_s7 + $0x30] sm:$0xff] }
  0xe5   :  { %2109 = vmatmul.mubr.msk.f32.vlgmr.msra.gmra.mrb[0].mxu1 %vm140_vm1, %v131_v19  ;;  %v1889_v19 = vld [vmem:[%s2791_s7 + $0x38] sm:$0xff] }
  0xe6   :  { %2111 = vmatprep.mubr.msk.f32.mxu1 %vm140_vm1, %v132_v20  ;;  %2312 = vmatpush3.bf16.msra.mxu1 %v2309_v13  ;;  %v2329_v20 = vpack.c.bf16 %v1889_v19, %v1888_v18 }
  0xe7   :  { %2314 = vmatprep.subr.bf16.mxu1 %v2313_v24 }
  0xe9   :  { %2112 = vmatmul.mubr.msk.f32.gmra.mrb[2].mxu1 %vm140_vm1, %v133_v21  ;;  %v1881_v21 = vld [vmem:[%s2797_s6] ss:$0 sm:$0xff] }
  0xea   :  { %2316 = vmatpush3.bf16.msra.mxu1 %v2313_v24 }
  0xeb   :  { %2318 = vmatprep.subr.bf16.mxu1 %v2317_v40 }
 0x1b8   :  { %v2110_v26 = vpop.f32.mrb[0].mxu1 }
 0x1b9   :  { %v225_v27 = vadd.f32 %v2110_v26, %v1867_v25  ;;  %v219_v28 = vpop.f32.mrb[1].mxu1 }
 0x1ba   :  { %v220_v29 = vadd.f32 %v1867_v25, %v219_v28 }
 0x1bb   :  { %v239_v32 = vmax.f32 %v225_v27, 0.0 }
 0x1bc   :  { %v238_v30 = vmax.f32 %v220_v29, 0.0  ;;  %v2113_v31 = vpop.f32.mrb[2].mxu1 }
 0x1bd   :  { %v235_v33 = vadd.f32 %v2113_v31, %v1867_v25  ;;  %v229_v34 = vpop.f32.mrb[3].mxu1 }
 0x1be   :  { %v230_v35 = vadd.f32 %v1867_v25, %v229_v34  ;;  %2122 = vmatprep.mubr.msk.f32.mxu1 %vm74_vm0, %v238_v30  ;;  %v1900_v34 = vld [vmem:[%s2793_s5 + $0x20] sm:$0xff] }
 0x1bf   :  { %2123 = vmatmul.mubr.msk.f32.vlgmr.msra.gmra.mrb[4].mxu1 %vm74_vm0, %v239_v32  ;;  %v241_v37 = vmax.f32 %v235_v33, 0.0 }
 0x1c0   :  { %v240_v36 = vmax.f32 %v230_v35, 0.0  ;;  %2320 = vmatpush3.bf16.msra.mxu1 %v2317_v40  ;;  %v1901_v35 = vld [vmem:[%s2793_s5 + $0x28] sm:$0xff] }
 0x1c1   :  { %2322 = vmatprep.subr.bf16.mxu1 %v2321_v4 }
 0x1c2   :  { %2125 = vmatprep.mubr.msk.f32.mxu1 %vm74_vm0, %v240_v36  ;;  %v2333_v36 = vpack.c.bf16 %v1901_v35, %v1900_v34 }
 0x1c3   :  { %2126 = vmatmul.mubr.msk.f32.gmra.mrb[6].mxu1 %vm74_vm0, %v241_v37  ;;  %v1891_v37 = vld [vmem:[%s2794_s8 + $0x1] ss:$0 sm:$0xff] }
 0x1c4   :  { %2324 = vmatpush3.bf16.msra.mxu1 %v2321_v4 }
 0x292   :  { %v2124_v42 = vpop.f32.mrb[4].mxu1 }
 0x293   :  { %v337_v43 = vadd.f32 %v2124_v42, %v1872_v41  ;;  %v331_v44 = vpop.f32.mrb[5].mxu1 }
 0x294   :  { %v332_v46 = vadd.f32 %v1872_v41, %v331_v44  ;;  %v1899_v44 = vld [vmem:[%s2796_s10 + $0x1] ss:$0 sm:$0xff] }
 0x295   :  { %v351_v47 = vmax.f32 %v337_v43, 0.0 }
 0x296   :  { %v350_v49 = vmax.f32 %v332_v46, 0.0  ;;  %v2127_v50 = vpop.f32.mrb[6].mxu1 }
 0x297   :  { %v362_v51 = vmul.f32 %v1877_v45, %v351_v47  ;;  %v347_v52 = vadd.f32 %v2127_v50, %v1872_v41  ;;  %v341_v53 = vpop.f32.mrb[7].mxu1 }
 0x298   :  { %v361_v54 = vmul.f32 %v1877_v45, %v350_v49  ;;  %v342_v55 = vadd.f32 %v1872_v41, %v341_v53  ;;  %v1897_v41 = vld [vmem:[%s2795_s9 + $0x1] ss:$0 sm:$0xff] }
 0x299   :  { %v373_v56 = vadd.f32 %v1878_v48, %v362_v51  ;;  %v353_v57 = vmax.f32 %v347_v52, 0.0 }
 0x29a   :  { %v372_v58 = vadd.f32 %v1878_v48, %v361_v54  ;;  %v352_v59 = vmax.f32 %v342_v55, 0.0 }
 0x29b   :  { %v364_v60 = vmul.f32 %v1877_v45, %v353_v57 }
 0x29c   :  { %v363_v61 = vmul.f32 %v1877_v45, %v352_v59  ;;  %v381_v62 = vpack.c.bf16 %v373_v56, %v372_v58 }
 0x29d   :  { %v375_v63 = vadd.f32 %v1878_v48, %v364_v60 }
 0x29e   :  { %v374_v0 = vadd.f32 %v1878_v48, %v363_v61  ;;  %2128 = vmatprep.subr.bf16.mxu0 %v381_v62 }
 0x29f   :  { %2129 = vmatpush3.bf16.msra.mxu0 %v381_v62  ;;  %v1902_v62 = vld [vmem:[%s2793_s5 + $0x30] sm:$0xff] }
 0x2a0   :  { %v382_v1 = vpack.c.bf16 %v375_v63, %v374_v0 }
 0x2a2   :  { %2130 = vmatprep.subr.bf16.mxu0 %v382_v1 }
 0x2a3   :  { %2131 = vmatpush3.bf16.msra.mxu0 %v382_v1  ;;  %v1912_v1 = vld [vmem:[%s2791_s7 + $0x40] sm:$0xff] }
 0x2a4   :  { %2326 = vmatprep.subr.bf16.mxu0 %v2325_v9  ;;  %v2341_v3 = vpack.c.bf16 %v1913_v2, %v1912_v1 }
 0x2a6   :  { %2133 = vmatmul.mubr.msk.bf16.vlgmr.msra.gmra.mrb[4].mxu0 %vm74_vm0, %v2513_v7 }
 0x2a7   :  { %2328 = vmatpush3.bf16.msra.mxu0 %v2325_v9 }
 0x2a8   :  { %2330 = vmatprep.subr.bf16.mxu0 %v2329_v20 }
 0x2ab   :  { %2332 = vmatpush3.bf16.msra.mxu0 %v2329_v20 }
 0x2ac   :  { %2334 = vmatprep.subr.bf16.mxu0 %v2333_v36 }
 0x379   :  { %v2134_v10 = vpop.f32.mrb[4].mxu0 }
 0x37a   :  { %v417_v11 = vpop.f32.mrb[5].mxu0  ;;  %v434_v16 = vadd.f32 %v2134_v10, %v374_v0 }
 0x37b   :  { %v432_v12 = vadd.f32 %v417_v11, %v372_v58  ;;  %v2135_v13 = vpop.f32.mrb[6].mxu0 }
 0x37c   :  { %v420_v14 = vpop.f32.mrb[7].mxu0  ;;  %v435_v17 = vadd.f32 %v2135_v13, %v375_v63  ;;  %v1903_v63 = vld [vmem:[%s2793_s5 + $0x38] sm:$0xff] }
 0x37d   :  { %v433_v15 = vadd.f32 %v420_v14, %v373_v56  ;;  %2144 = vmatprep.mubr.msk.f32.mxu1 %vm74_vm0, %v432_v12  ;;  %v2337_v0 = vpack.c.bf16 %v1903_v63, %v1902_v62  ;;  %v1914_v14 = vld [vmem:[%s2791_s7 + $0x50] sm:$0xff]  ;;  %v1939_v62 = vld [vmem:[%s2791_s7 + $0x68] sm:$0xff] }
 0x37f   :  { %2145 = vmatmul.mubr.msk.f32.vlgmr.msra.gmra.mrb[8].mxu1 %vm74_vm0, %v433_v15  ;;  %v1915_v15 = vld [vmem:[%s2791_s7 + $0x58] sm:$0xff] }
 0x380   :  { %2147 = vmatprep.mubr.msk.f32.mxu1 %vm74_vm0, %v434_v16  ;;  %v2345_v16 = vpack.c.bf16 %v1915_v15, %v1914_v14 }
 0x383   :  { %2148 = vmatmul.mubr.msk.f32.gmra.mrb[10].mxu1 %vm74_vm0, %v435_v17  ;;  %v1907_v17 = vld [vmem:[%s2797_s6 + $0x1] ss:$0 sm:$0xff] }
 0x384   :  { %2168 = vmatprep.mubr.msk.bf16.mxu1 %vm74_vm0, %v2506_v6 }
 0x452   :  { %v2146_v22 = vpop.f32.mrb[8].mxu1 }
 0x453   :  { %v526_v23 = vadd.f32 %v2146_v22, %v1881_v21  ;;  %v520_v24 = vpop.f32.mrb[9].mxu1 }
 0x454   :  { %v521_v25 = vadd.f32 %v1881_v21, %v520_v24 }
 0x455   :  { %v540_v28 = vmax.f32 %v526_v23, 0.0 }
 0x456   :  { %v539_v26 = vmax.f32 %v521_v25, 0.0  ;;  %v2149_v27 = vpop.f32.mrb[10].mxu1 }
 0x457   :  { %v536_v29 = vadd.f32 %v2149_v27, %v1881_v21  ;;  %v530_v30 = vpop.f32.mrb[11].mxu1 }
 0x458   :  { %v531_v31 = vadd.f32 %v1881_v21, %v530_v30  ;;  %2158 = vmatprep.mubr.msk.f32.mxu0 %vm74_vm0, %v539_v26  ;;  %v1926_v30 = vld [vmem:[%s2793_s5 + $0x40] sm:$0xff] }
 0x459   :  { %2159 = vmatmul.mubr.msk.f32.vlgmr.msra.gmra.mrb[8].mxu0 %vm74_vm0, %v540_v28  ;;  %v542_v33 = vmax.f32 %v536_v29, 0.0 }
 0x45a   :  { %v541_v32 = vmax.f32 %v531_v31, 0.0  ;;  %2336 = vmatpush3.bf16.msra.mxu0 %v2333_v36  ;;  %v1927_v31 = vld [vmem:[%s2793_s5 + $0x48] sm:$0xff] }
 0x45b   :  { %2338 = vmatprep.subr.bf16.mxu0 %v2337_v0 }
 0x45c   :  { %2161 = vmatprep.mubr.msk.f32.mxu0 %vm74_vm0, %v541_v32  ;;  %v2349_v32 = vpack.c.bf16 %v1927_v31, %v1926_v30 }
 0x45d   :  { %2162 = vmatmul.mubr.msk.f32.gmra.mrb[10].mxu0 %vm74_vm0, %v542_v33  ;;  %v1917_v33 = vld [vmem:[%s2794_s8 + $0x2] ss:$0 sm:$0xff] }
 0x45e   :  { %2340 = vmatpush3.bf16.msra.mxu0 %v2337_v0 }
 0x52c   :  { %v2160_v38 = vpop.f32.mrb[8].mxu0 }
 0x52d   :  { %v640_v39 = vadd.f32 %v2160_v38, %v1891_v37  ;;  %v634_v40 = vpop.f32.mrb[9].mxu0 }
 0x52e   :  { %v635_v42 = vadd.f32 %v1891_v37, %v634_v40  ;;  %v1925_v40 = vld [vmem:[%s2796_s10 + $0x2] ss:$0 sm:$0xff] }
 0x52f   :  { %v654_v43 = vmax.f32 %v640_v39, 0.0 }
 0x530   :  { %v653_v45 = vmax.f32 %v635_v42, 0.0  ;;  %v2163_v46 = vpop.f32.mrb[10].mxu0 }
 0x531   :  { %v666_v47 = vmul.f32 %v1897_v41, %v654_v43  ;;  %v650_v48 = vadd.f32 %v2163_v46, %v1891_v37  ;;  %v644_v49 = vpop.f32.mrb[11].mxu0 }
 0x532   :  { %v665_v50 = vmul.f32 %v1897_v41, %v653_v45  ;;  %v645_v51 = vadd.f32 %v1891_v37, %v644_v49  ;;  %v1923_v37 = vld [vmem:[%s2795_s9 + $0x2] ss:$0 sm:$0xff] }
 0x533   :  { %v678_v52 = vadd.f32 %v1899_v44, %v666_v47  ;;  %v656_v53 = vmax.f32 %v650_v48, 0.0 }
 0x534   :  { %v677_v54 = vadd.f32 %v1899_v44, %v665_v50  ;;  %v655_v55 = vmax.f32 %v645_v51, 0.0 }
 0x535   :  { %v668_v56 = vmul.f32 %v1897_v41, %v656_v53 }
 0x536   :  { %v667_v57 = vmul.f32 %v1897_v41, %v655_v55  ;;  %v688_v58 = vpack.c.bf16 %v678_v52, %v677_v54 }
 0x537   :  { %v680_v59 = vadd.f32 %v1899_v44, %v668_v56 }
 0x538   :  { %v679_v60 = vadd.f32 %v1899_v44, %v667_v57  ;;  %2164 = vmatprep.subr.bf16.mxu1 %v688_v58 }
 0x539   :  { %2165 = vmatpush3.bf16.msra.mxu1 %v688_v58  ;;  %v1928_v58 = vld [vmem:[%s2793_s5 + $0x50] sm:$0xff] }
 0x53a   :  { %v689_v61 = vpack.c.bf16 %v680_v59, %v679_v60 }
 0x53c   :  { %2166 = vmatprep.subr.bf16.mxu1 %v689_v61 }
 0x53d   :  { %2167 = vmatpush3.bf16.msra.mxu1 %v689_v61  ;;  %v1938_v61 = vld [vmem:[%s2791_s7 + $0x60] sm:$0xff] }
 0x53e   :  { %2342 = vmatprep.subr.bf16.mxu1 %v2341_v3  ;;  %v2357_v63 = vpack.c.bf16 %v1939_v62, %v1938_v61 }
 0x540   :  { %2169 = vmatmul.mubr.msk.bf16.vlgmr.msra.gmra.mrb[12].mxu1 %vm74_vm0, %v2513_v7 }
 0x541   :  { %2344 = vmatpush3.bf16.msra.mxu1 %v2341_v3 }
 0x542   :  { %2346 = vmatprep.subr.bf16.mxu1 %v2345_v16 }
 0x545   :  { %2348 = vmatpush3.bf16.msra.mxu1 %v2345_v16 }
 0x546   :  { %2350 = vmatprep.subr.bf16.mxu1 %v2349_v32 }
 0x613   :  { %v2170_v4 = vpop.f32.mrb[12].mxu1 }
 0x614   :  { %v724_v5 = vpop.f32.mrb[13].mxu1  ;;  %v741_v12 = vadd.f32 %v2170_v4, %v679_v60 }
 0x615   :  { %v739_v8 = vadd.f32 %v724_v5, %v677_v54  ;;  %v2171_v9 = vpop.f32.mrb[14].mxu1 }
 0x616   :  { %v727_v10 = vpop.f32.mrb[15].mxu1  ;;  %v742_v13 = vadd.f32 %v2171_v9, %v680_v59  ;;  %v1929_v59 = vld [vmem:[%s2793_s5 + $0x58] sm:$0xff] }
 0x617   :  { %v740_v11 = vadd.f32 %v727_v10, %v678_v52  ;;  %2180 = vmatprep.mubr.msk.f32.mxu0 %vm74_vm0, %v739_v8  ;;  %v2353_v60 = vpack.c.bf16 %v1929_v59, %v1928_v58  ;;  %v1940_v10 = vld [vmem:[%s2791_s7 + $0x70] sm:$0xff] }
 0x619   :  { %2181 = vmatmul.mubr.msk.f32.vlgmr.msra.gmra.mrb[12].mxu0 %vm74_vm0, %v740_v11  ;;  %v1941_v11 = vld [vmem:[%s2791_s7 + $0x78] sm:$0xff] }
 0x61a   :  { %2183 = vmatprep.mubr.msk.f32.mxu0 %vm74_vm0, %v741_v12  ;;  %v2361_v12 = vpack.c.bf16 %v1941_v11, %v1940_v10 }
 0x61d   :  { %2184 = vmatmul.mubr.msk.f32.gmra.mrb[14].mxu0 %vm74_vm0, %v742_v13  ;;  %v1933_v13 = vld [vmem:[%s2797_s6 + $0x2] ss:$0 sm:$0xff] }
 0x61e   :  { %2204 = vmatprep.mubr.msk.bf16.mxu0 %vm74_vm0, %v2506_v6 }
 0x6ec   :  { %v2182_v18 = vpop.f32.mrb[12].mxu0 }
 0x6ed   :  { %v833_v19 = vadd.f32 %v2182_v18, %v1907_v17  ;;  %v827_v20 = vpop.f32.mrb[13].mxu0 }
 0x6ee   :  { %v828_v21 = vadd.f32 %v1907_v17, %v827_v20 }
 0x6ef   :  { %v847_v24 = vmax.f32 %v833_v19, 0.0 }
 0x6f0   :  { %v846_v22 = vmax.f32 %v828_v21, 0.0  ;;  %v2185_v23 = vpop.f32.mrb[14].mxu0 }
 0x6f1   :  { %v843_v25 = vadd.f32 %v2185_v23, %v1907_v17  ;;  %v837_v26 = vpop.f32.mrb[15].mxu0 }
 0x6f2   :  { %v838_v27 = vadd.f32 %v1907_v17, %v837_v26  ;;  %2194 = vmatprep.mubr.msk.f32.mxu1 %vm74_vm0, %v846_v22  ;;  %v1953_v26 = vld [vmem:[%s2793_s5 + $0x68] sm:$0xff] }
 0x6f3   :  { %2195 = vmatmul.mubr.msk.f32.vlgmr.msra.gmra.mrb[16].mxu1 %vm74_vm0, %v847_v24  ;;  %v849_v29 = vmax.f32 %v843_v25, 0.0  ;;  %v1952_v25 = vld [vmem:[%s2793_s5 + $0x60] sm:$0xff] }
 0x6f4   :  { %v848_v28 = vmax.f32 %v838_v27, 0.0  ;;  %2352 = vmatpush3.bf16.msra.mxu1 %v2349_v32  ;;  %v2365_v27 = vpack.c.bf16 %v1953_v26, %v1952_v25  ;;  %v1949_v32 = vld [vmem:[%s2795_s9 + $0x3] ss:$0 sm:$0xff]  ;;  %v1679_v25 = vld [vmem:[%s2798_s11 + $0x18] sm:$0xff] }
 0x6f5   :  { %2354 = vmatprep.subr.bf16.mxu1 %v2353_v60 }
 0x6f6   :  { %2197 = vmatprep.mubr.msk.f32.mxu1 %vm74_vm0, %v848_v28  ;;  %v1943_v28 = vld [vmem:[%s2794_s8 + $0x3] ss:$0 sm:$0xff] }
 0x6f7   :  { %2198 = vmatmul.mubr.msk.f32.gmra.mrb[18].mxu1 %vm74_vm0, %v849_v29 }
 0x6f8   :  { %2356 = vmatpush3.bf16.msra.mxu1 %v2353_v60 }
 0x7c6   :  { %v2196_v34 = vpop.f32.mrb[16].mxu1 }
 0x7c7   :  { %v947_v35 = vadd.f32 %v2196_v34, %v1917_v33  ;;  %v941_v36 = vpop.f32.mrb[17].mxu1 }
 0x7c8   :  { %v942_v38 = vadd.f32 %v1917_v33, %v941_v36 }
 0x7c9   :  { %v961_v39 = vmax.f32 %v947_v35, 0.0  ;;  %v1951_v35 = vld [vmem:[%s2796_s10 + $0x3] ss:$0 sm:$0xff] }
 0x7ca   :  { %v960_v41 = vmax.f32 %v942_v38, 0.0  ;;  %v2199_v42 = vpop.f32.mrb[18].mxu1 }
 0x7cb   :  { %v973_v43 = vmul.f32 %v1923_v37, %v961_v39  ;;  %v957_v44 = vadd.f32 %v2199_v42, %v1917_v33  ;;  %v951_v45 = vpop.f32.mrb[19].mxu1 }
 0x7cc   :  { %v972_v46 = vmul.f32 %v1923_v37, %v960_v41  ;;  %v952_v47 = vadd.f32 %v1917_v33, %v951_v45 }
 0x7cd   :  { %v985_v48 = vadd.f32 %v1925_v40, %v973_v43  ;;  %v963_v49 = vmax.f32 %v957_v44, 0.0 }
 0x7ce   :  { %v984_v50 = vadd.f32 %v1925_v40, %v972_v46  ;;  %v962_v51 = vmax.f32 %v952_v47, 0.0 }
 0x7cf   :  { %v975_v52 = vmul.f32 %v1923_v37, %v963_v49 }
 0x7d0   :  { %v974_v53 = vmul.f32 %v1923_v37, %v962_v51  ;;  %v995_v54 = vpack.c.bf16 %v985_v48, %v984_v50 }
 0x7d1   :  { %v987_v55 = vadd.f32 %v1925_v40, %v975_v52 }
 0x7d2   :  { %v986_v56 = vadd.f32 %v1925_v40, %v974_v53  ;;  %2200 = vmatprep.subr.bf16.mxu0 %v995_v54  ;;  %v1954_v53 = vld [vmem:[%s2793_s5 + $0x70] sm:$0xff] }
 0x7d3   :  { %2201 = vmatpush3.bf16.msra.mxu0 %v995_v54  ;;  %v1955_v54 = vld [vmem:[%s2793_s5 + $0x78] sm:$0xff] }
 0x7d4   :  { %v996_v57 = vpack.c.bf16 %v987_v55, %v986_v56 }
 0x7d6   :  { %2202 = vmatprep.subr.bf16.mxu0 %v996_v57 }
 0x7d7   :  { %2203 = vmatpush3.bf16.msra.mxu0 %v996_v57  ;;  %v1965_v57 = vld [vmem:[%s2791_s7 + $0x88] sm:$0xff] }
 0x7d8   :  { %2358 = vmatprep.subr.bf16.mxu0 %v2357_v63 }
 0x7da   :  { %2205 = vmatmul.mubr.msk.bf16.vlgmr.msra.gmra.mrb[16].mxu0 %vm74_vm0, %v2513_v7 }
 0x7db   :  { %2360 = vmatpush3.bf16.msra.mxu0 %v2357_v63 }
 0x7dc   :  { %2362 = vmatprep.subr.bf16.mxu0 %v2361_v12 }
 0x7df   :  { %2364 = vmatpush3.bf16.msra.mxu0 %v2361_v12 }
 0x7e0   :  { %2366 = vmatprep.subr.bf16.mxu0 %v2365_v27 }
 0x8ad   :  { %v2206_v0 = vpop.f32.mrb[16].mxu0 }
 0x8ae   :  { %v1031_v1 = vpop.f32.mrb[17].mxu0  ;;  %v1048_v8 = vadd.f32 %v2206_v0, %v986_v56  ;;  %v1964_v56 = vld [vmem:[%s2791_s7 + $0x80] sm:$0xff] }
 0x8af   :  { %v1046_v2 = vadd.f32 %v1031_v1, %v984_v50  ;;  %v2207_v3 = vpop.f32.mrb[18].mxu0 }
 0x8b0   :  { %v1034_v4 = vpop.f32.mrb[19].mxu0  ;;  %v1049_v9 = vadd.f32 %v2207_v3, %v987_v55  ;;  %v2369_v55 = vpack.c.bf16 %v1955_v54, %v1954_v53  ;;  %v1967_v3 = vld [vmem:[%s2791_s7 + $0x98] sm:$0xff]  ;;  %v1761_v53 = vld [vmem:[%s2800_s13] sm:$0xff]  ;;  %v1762_v54 = vld [vmem:[%s2800_s13 + $0x8] sm:$0xff] }
 0x8b1   :  { %v1047_v5 = vadd.f32 %v1034_v4, %v985_v48  ;;  %2216 = vmatprep.mubr.msk.f32.mxu1 %vm74_vm0, %v1046_v2  ;;  %v1966_v2 = vld [vmem:[%s2791_s7 + $0x90] sm:$0xff] }
 0x8b2   :  { %v2377_v4 = vpack.c.bf16 %v1967_v3, %v1966_v2 }
 0x8b3   :  { %2217 = vmatmul.mubr.msk.f32.vlgmr.msra.gmra.mrb[20].mxu1 %vm74_vm0, %v1047_v5  ;;  %v1959_v5 = vld [vmem:[%s2797_s6 + $0x3] ss:$0 sm:$0xff] }
 0x8b4   :  { %2219 = vmatprep.mubr.msk.f32.mxu1 %vm74_vm0, %v1048_v8 }
 0x8b7   :  { %2220 = vmatmul.mubr.msk.f32.gmra.mrb[22].mxu1 %vm74_vm0, %v1049_v9 }
 0x8b8   :  { %2240 = vmatprep.mubr.msk.bf16.mxu1 %vm74_vm0, %v2506_v6 }
 0x986   :  { %v2218_v14 = vpop.f32.mrb[20].mxu1 }
 0x987   :  { %v1140_v15 = vadd.f32 %v2218_v14, %v1933_v13  ;;  %v1134_v16 = vpop.f32.mrb[21].mxu1 }
 0x988   :  { %v1135_v17 = vadd.f32 %v1933_v13, %v1134_v16 }
 0x989   :  { %v1154_v19 = vmax.f32 %v1140_v15, 0.0 }
 0x98a   :  { %v1153_v6 = vmax.f32 %v1135_v17, 0.0  ;;  %v2221_v18 = vpop.f32.mrb[22].mxu1 }
 0x98b   :  { %v1150_v20 = vadd.f32 %v2221_v18, %v1933_v13  ;;  %v1144_v21 = vpop.f32.mrb[23].mxu1 }
 0x98c   :  { %v1145_v22 = vadd.f32 %v1933_v13, %v1144_v21  ;;  %2230 = vmatprep.mubr.msk.f32.mxu0 %vm74_vm0, %v1153_v6  ;;  %v1676_v21 = vld [vmem:[%s2798_s11] sm:$0xff] }
 0x98d   :  { %2231 = vmatmul.mubr.msk.f32.vlgmr.msra.gmra.mrb[20].mxu0 %vm74_vm0, %v1154_v19  ;;  %v1156_v24 = vmax.f32 %v1150_v20, 0.0  ;;  %v2408_v19 = vmov 0.0|0.0   ;;  %v2410_v20 = vmov 0.0  }
 0x98e   :  { %v1155_v23 = vmax.f32 %v1145_v22, 0.0  ;;  %2368 = vmatpush3.bf16.msra.mxu0 %v2365_v27  ;;  %v1677_v22 = vld [vmem:[%s2798_s11 + $0x8] sm:$0xff]  ;;  %v1969_v27 = vld [vmem:[%s2794_s8 + $0x4] ss:$0 sm:$0xff] }
 0x98f   :  { %2370 = vmatprep.subr.bf16.mxu0 %v2369_v55 }
 0x990   :  { %2233 = vmatprep.mubr.msk.f32.mxu0 %vm74_vm0, %v1155_v23  ;;  %v1678_v23 = vld [vmem:[%s2798_s11 + $0x10] sm:$0xff] }
 0x991   :  { %2234 = vmatmul.mubr.msk.f32.gmra.mrb[22].mxu0 %vm74_vm0, %v1156_v24  ;;  %v2388_v24 = vpack.c.bf16 %v1677_v22, %v1676_v21  ;;  %v2391_v26 = vpack.c.bf16 %v1679_v25, %v1678_v23 }
 0x992   :  { %2372 = vmatpush3.bf16.msra.mxu0 %v2369_v55  ;;  %v2394_v55 = vpack.c.bf16 %v1762_v54, %v1761_v53 }
 0x993   :  { %2381 = vmatprep.subr.bf16.mxu0 %v2408_v19 }
 0xa60   :  { %v2232_v29 = vpop.f32.mrb[20].mxu0 }
 0xa61   :  { %v1254_v30 = vadd.f32 %v2232_v29, %v1943_v28  ;;  %v1248_v31 = vpop.f32.mrb[21].mxu0 }
 0xa62   :  { %v1249_v33 = vadd.f32 %v1943_v28, %v1248_v31  ;;  %v1975_v31 = vld [vmem:[%s2795_s9 + $0x4] ss:$0 sm:$0xff] }
 0xa63   :  { %v1268_v34 = vmax.f32 %v1254_v30, 0.0 }
 0xa64   :  { %v1267_v36 = vmax.f32 %v1249_v33, 0.0  ;;  %v2235_v37 = vpop.f32.mrb[22].mxu0 }
 0xa65   :  { %v1280_v38 = vmul.f32 %v1949_v32, %v1268_v34  ;;  %v1264_v39 = vadd.f32 %v2235_v37, %v1943_v28  ;;  %v1258_v40 = vpop.f32.mrb[23].mxu0  ;;  %v1977_v34 = vld [vmem:[%s2796_s10 + $0x4] ss:$0 sm:$0xff] }
 0xa66   :  { %v1279_v41 = vmul.f32 %v1949_v32, %v1267_v36  ;;  %v1259_v42 = vadd.f32 %v1943_v28, %v1258_v40 }
 0xa67   :  { %v1292_v43 = vadd.f32 %v1951_v35, %v1280_v38  ;;  %v1270_v44 = vmax.f32 %v1264_v39, 0.0 }
 0xa68   :  { %v1291_v45 = vadd.f32 %v1951_v35, %v1279_v41  ;;  %v1269_v46 = vmax.f32 %v1259_v42, 0.0 }
 0xa69   :  { %v1282_v47 = vmul.f32 %v1949_v32, %v1270_v44 }
 0xa6a   :  { %v1281_v48 = vmul.f32 %v1949_v32, %v1269_v46  ;;  %v1302_v49 = vpack.c.bf16 %v1292_v43, %v1291_v45 }
 0xa6b   :  { %v1294_v50 = vadd.f32 %v1951_v35, %v1282_v47 }
 0xa6c   :  { %v1293_v51 = vadd.f32 %v1951_v35, %v1281_v48  ;;  %2236 = vmatprep.subr.bf16.mxu1 %v1302_v49 }
 0xa6d   :  { %2237 = vmatpush3.bf16.msra.mxu1 %v1302_v49 }
 0xa6e   :  { %v1303_v52 = vpack.c.bf16 %v1294_v50, %v1293_v51 }
 0xa70   :  { %2238 = vmatprep.subr.bf16.mxu1 %v1303_v52 }
 0xa71   :  { %2239 = vmatpush3.bf16.msra.mxu1 %v1303_v52  ;;  %v1602_v52 = vld [vmem:[%s2799_s2] sm:$0xf] }
 0xa74   :  { %2241 = vmatmul.mubr.msk.bf16.vlgmr.msra.gmra.mrb[24].mxu1 %vm74_vm0, %v2513_v7  ;;  %v2373_v7 = vpack.c.bf16 %v1965_v57, %v1964_v56 }
 0xa76   :  { %2374 = vmatprep.subr.bf16.mxu1 %v2373_v7 }
 0xa77   :  { %2376 = vmatpush3.bf16.msra.mxu1 %v2373_v7  ;;  %v1763_v7 = vld [vmem:[%s2800_s13 + $0x10] sm:$0xff] }
 0xa78   :  { %2378 = vmatprep.subr.bf16.mxu1 %v2377_v4 }
 0xa7b   :  { %2380 = vmatpush3.bf16.msra.mxu1 %v2377_v4 }
 0xa7c   :  { %2387 = vmatprep.subr.bf16.mxu1 %v2408_v19 }
 0xb47   :  { %v2242_v58 = vpop.f32.mrb[24].mxu1 }
 0xb48   :  { %v1338_v59 = vpop.f32.mrb[25].mxu1  ;;  %v1355_v0 = vadd.f32 %v2242_v58, %v1293_v51  ;;  %v1764_v58 = vld [vmem:[%s2800_s13 + $0x18] sm:$0xff] }
 0xb49   :  { %v1353_v60 = vadd.f32 %v1338_v59, %v1291_v45  ;;  %v2243_v61 = vpop.f32.mrb[26].mxu1  ;;  %v2397_v59 = vpack.c.bf16 %v1764_v58, %v1763_v7 }
 0xb4a   :  { %v1341_v62 = vpop.f32.mrb[27].mxu1  ;;  %v1356_v1 = vadd.f32 %v2243_v61, %v1294_v50 }
 0xb4b   :  { %v1354_v63 = vadd.f32 %v1341_v62, %v1292_v43  ;;  %2252 = vmatprep.mubr.msk.f32.mxu0 %vm74_vm0, %v1353_v60  ;;  %v1979_v60 = vld [vmem:[%s2801_s12] ss:$0 sm:$0xff] }
 0xb4d   :  { %2253 = vmatmul.mubr.msk.f32.vlgmr.msra.gmra.mrb[24].mxu0 %vm74_vm0, %v1354_v63 }
 0xb4e   :  { %2255 = vmatprep.mubr.msk.f32.mxu0 %vm74_vm0, %v1355_v0 }
 0xb51   :  { %2256 = vmatmul.mubr.msk.f32.gmra.mrb[26].mxu0 %vm74_vm0, %v1356_v1  ;;  %v1981_v1 = vld [vmem:[%s2802_s14] ss:$0 sm:$0xff] }
 0xb52   :  { %2280 = vmatprep.mubr.msk.f32.mxu0 %vm2409_vm2, %v2410_v20 }
 0xc20   :  { %v2254_v8 = vpop.f32.mrb[24].mxu0 }
 0xc21   :  { %v1447_v9 = vadd.f32 %v2254_v8, %v1959_v5  ;;  %v1441_v10 = vpop.f32.mrb[25].mxu0 }
 0xc22   :  { %v1442_v11 = vadd.f32 %v1959_v5, %v1441_v10 }
 0xc23   :  { %v1461_v14 = vmax.f32 %v1447_v9, 0.0 }
 0xc24   :  { %v1460_v12 = vmax.f32 %v1442_v11, 0.0  ;;  %v2257_v13 = vpop.f32.mrb[26].mxu0 }
 0xc25   :  { %v1457_v15 = vadd.f32 %v2257_v13, %v1959_v5  ;;  %v1451_v16 = vpop.f32.mrb[27].mxu0 }
 0xc26   :  { %v1452_v17 = vadd.f32 %v1959_v5, %v1451_v16  ;;  %2266 = vmatprep.mubr.msk.f32.mxu1 %vm74_vm0, %v1460_v12 }
 0xc27   :  { %2267 = vmatmul.mubr.msk.f32.vlgmr.msra.gmra.mrb[28].mxu1 %vm74_vm0, %v1461_v14  ;;  %v1463_v18 = vmax.f32 %v1457_v15, 0.0 }
 0xc28   :  { %v1462_v6 = vmax.f32 %v1452_v17, 0.0  ;;  %2389 = vmatpush3.bf16.msra.mxu1 %v2388_v24 }
 0xc29   :  { %2390 = vmatprep.subr.bf16.mxu1 %v2408_v19 }
 0xc2a   :  { %2269 = vmatprep.mubr.msk.f32.mxu1 %vm74_vm0, %v1462_v6 }
 0xc2b   :  { %2270 = vmatmul.mubr.msk.f32.gmra.mrb[30].mxu1 %vm74_vm0, %v1463_v18 }
 0xc2c   :  { %2291 = vmatprep.mubr.msk.f32.mxu1 %vm2409_vm2, %v2410_v20  ;;  %2392 = vmatpush3.bf16.msra.mxu1 %v2391_v26 }
 0xcfa   :  { %v2268_v28 = vpop.f32.mrb[28].mxu1 }
 0xcfb   :  { %v1561_v29 = vadd.f32 %v2268_v28, %v1969_v27  ;;  %v1555_v30 = vpop.f32.mrb[29].mxu1 }
 0xcfc   :  { %v1556_v32 = vadd.f32 %v1969_v27, %v1555_v30 }
 0xcfd   :  { %v1575_v33 = vmax.f32 %v1561_v29, 0.0 }
 0xcfe   :  { %v1574_v35 = vmax.f32 %v1556_v32, 0.0  ;;  %v2271_v36 = vpop.f32.mrb[30].mxu1 }
 0xcff   :  { %v1587_v37 = vmul.f32 %v1975_v31, %v1575_v33  ;;  %v1571_v38 = vadd.f32 %v2271_v36, %v1969_v27  ;;  %v1565_v39 = vpop.f32.mrb[31].mxu1 }
 0xd00   :  { %v1586_v40 = vmul.f32 %v1975_v31, %v1574_v35  ;;  %v1566_v41 = vadd.f32 %v1969_v27, %v1565_v39 }
 0xd01   :  { %v1599_v42 = vadd.f32 %v1977_v34, %v1587_v37  ;;  %v1577_v43 = vmax.f32 %v1571_v38, 0.0 }
 0xd02   :  { %v1598_v44 = vadd.f32 %v1977_v34, %v1586_v40  ;;  %v1576_v45 = vmax.f32 %v1566_v41, 0.0 }
 0xd03   :  { %v1589_v46 = vmul.f32 %v1975_v31, %v1577_v43 }
 0xd04   :  { %v2382_v47 = vpack.c.bf16 %v1599_v42, %v1598_v44  ;;  %v1588_v48 = vmul.f32 %v1975_v31, %v1576_v45 }
 0xd05   :  { %v1601_v49 = vadd.f32 %v1977_v34, %v1589_v46 }
 0xd06   :  { %v1600_v50 = vadd.f32 %v1977_v34, %v1588_v48  ;;  %2383 = vmatpush3.bf16.msra.mxu0 %v2382_v47 }
 0xd07   :  { %2384 = vmatprep.subr.bf16.mxu0 %v2408_v19 }
 0xd08   :  { %v2385_v51 = vpack.c.bf16 %v1601_v49, %v1600_v50 }
 0xd0a   :  { %2386 = vmatpush3.bf16.msra.mxu0 %v2385_v51 }
 0xd0b   :  { %2393 = vmatprep.subr.bf16.mxu0 %v2408_v19 }
 0xd0d   :  { %2281 = vmatmul.mubr.msk.f32.vlgmr.msra.gmra.mrb[28].mxu0 %vm74_vm0, %v1602_v52 }
 0xd0e   :  { %2302 = vmatprep.mubr.msk.f32.mxu0 %vm2409_vm2, %v2410_v20  ;;  %2395 = vmatpush3.bf16.msra.mxu0 %v2394_v55 }
 0xd0f   :  { %2396 = vmatprep.subr.bf16.mxu0 %v2408_v19 }
 0xd12   :  { %2398 = vmatpush3.bf16.msra.mxu0 %v2397_v59 }
 0xde0   :  { %v1672_v56 = vpop.f32.mrb[28].mxu0 }
 0xde1   :  { %v2282_v57 = vpop.f32.mrb[29].mxu0  ;;  %2292 = vmatmul.mubr.msk.f32.vlgmr.msra.gmra.mrb[32].mxu1 %vm74_vm0, %v1672_v56 }
 0xeb4   :  { %v1756_v61 = vpop.f32.mrb[32].mxu1 }
 0xeb5   :  { %v1757_v62 = vadd.f32 %v1979_v60, %v1756_v61  ;;  %v2293_v63 = vpop.f32.mrb[33].mxu1 }
 0xeb7   :  { %v1760_v0 = vmax.f32 %v1757_v62, 0.0 }
 0xeb9   :  { %2303 = vmatmul.mubr.msk.f32.vlgmr.msra.gmra.mrb[30].mxu0 %vm74_vm0, %v1760_v0 }
 0xf8c   :  { %v1841_v2 = vpop.f32.mrb[30].mxu0 }
 0xf8d   :  { %v1842_v3 = vadd.f32 %v1981_v1, %v1841_v2  ;;  %v2304_v4 = vpop.f32.mrb[31].mxu0 }
 0xf8f   :  { %v1846_v5 = vsel %vm1845_vm3, %v1842_v3, -inf }
 0xf90   :  { %1847 = vmax.xlane.f32.xlu0 %v1846_v5 }
0x101d   :  { %v1848_v8 = vpop.xlane.xlu0 %1847 }
0x101e   :  { %v1849_v9 = vsub.f32 %v1842_v3, %v1848_v8 }
0x1020   :  { %v1850_v10 = vmul.f32 1.442695, %v1849_v9 }
0x1022   :  { %2404 = vpow2.f32 %v1850_v10 }
0x102c   :  { %v2405_v11 = vpop.eup %2404 }
0x102d   :  { %v1852_v12 = vsel %vm1845_vm3, %v2405_v11, 0.0 }
0x102e   :  { %1853 = vadd.xlane.f32.xlu0 %v1852_v12 }
0x10bb   :  { %v1854_v13 = vpop.xlane.xlu0 %1853 }
0x10bc   :  { %2406 = vlog2.f32 %v1854_v13 }
0x10c6   :  { %v2407_v14 = vpop.eup %2406 }
0x10c7   :  { %v1856_v15 = vmul.f32 0.6931472, %v2407_v14 }
0x10c9   :  { %v1857_v16 = vsub.f32 %v1849_v9, %v1856_v15 }
0x10cb   :  { %1858 = vst.msk [vmem:[%s2803_s15] sm:$0xf] %vm1845_vm3, %v1857_v16 }

</bundles_post_ra>
